<compile_context>
chip_gen: v6e
topology: v6e:2x2x1
jax: 0.10.0
libtpu: 0.0.40
codegen_flags: <defaults>
</compile_context>

<pallas_src>
import functools

import jax
import jax.numpy as jnp
from jax.experimental import pallas as pl
from jax.experimental.pallas import tpu as pltpu

EPS = 1e-5


def _round_up(x, m):
    return (x + m - 1) // m * m


def _round_down(x, m):
    return (x // m) * m


@functools.lru_cache(maxsize=None)
def _vmem_limit_bytes():
    """Generation-aware scoped-VMEM limit (headroom below physical VMEM)."""
    phys = None
    try:
        phys = getattr(pltpu.get_tpu_info(), "vmem_capacity_bytes", None)
    except Exception:
        phys = None
    if not phys:
        phys = 64 * 1024 * 1024          # conservative default (v7x per-TC)
    return int(phys * 0.72)              # ~92 MiB v5e/v6e, ~46 MiB v7x


def _block_elem_budget(itemsize):
    """Max elements per (C, tile) block.

    Pipeline holds ~2 input + 2 output buffers in the input dtype plus ~2
    full-block f32 temporaries for the in-register upcast compute.
    """
    budget = _vmem_limit_bytes() - (4 << 20)
    return max(budget // (4 * itemsize + 2 * 4), 8 * 128)


# -----------------------------------------------------------------------------
# Pallas kernels
# -----------------------------------------------------------------------------
def _gct_fused_kernel(x_ref, alpha_ref, gamma_ref, beta_ref, o_ref, *, eps, inv_c):
    """One batch element: x block (1, C, HW); gate + apply, fused."""
    x = x_ref[0].astype(jnp.float32)                          # (C, HW)
    ss = jnp.sum(x * x, axis=-1, keepdims=True)               # (C, 1) lane reduce
    emb = jnp.sqrt(ss + eps) * alpha_ref[...]                 # (C, 1)
    mean = jnp.sum(emb * emb, axis=0, keepdims=True) * inv_c  # (1, 1) sublane reduce
    norm = gamma_ref[...] * jax.lax.rsqrt(mean + eps)         # (C, 1)
    gate = 1.0 + jnp.tanh(emb * norm + beta_ref[...])         # (C, 1)
    o_ref[0] = (x * gate).astype(o_ref.dtype)                 # lane-dense store


def _gct_reduce_kernel(x_ref, alpha_ref, gamma_ref, beta_ref, gate_ref, acc_ref,
                       *, eps, inv_c, hw, tile_hw, mask_tail):
    """Pass 1 (tiled): accumulate sum(x^2) over spatial tiles, emit gate."""
    t = pl.program_id(1)

    @pl.when(t == 0)
    def _():
        acc_ref[...] = jnp.zeros_like(acc_ref)

    x = x_ref[0].astype(jnp.float32)                          # (C, tile_hw)
    xsq = x * x
    if mask_tail:
        # Ragged last tile: out-of-bounds lanes contain garbage -> zero them.
        lane = jax.lax.broadcasted_iota(jnp.int32, xsq.shape, 1)
        xsq = jnp.where(lane < (hw - t * tile_hw), xsq, 0.0)
    acc_ref[...] += jnp.sum(xsq, axis=-1, keepdims=True)      # (C, 1)

    @pl.when(t == pl.num_programs(1) - 1)
    def _():
        emb = jnp.sqrt(acc_ref[...] + eps) * alpha_ref[...]
        mean = jnp.sum(emb * emb, axis=0, keepdims=True) * inv_c
        norm = gamma_ref[...] * jax.lax.rsqrt(mean + eps)
        gate_ref[0] = (1.0 + jnp.tanh(emb * norm + beta_ref[...])).astype(gate_ref.dtype)


def _gct_apply_kernel(x_ref, gate_ref, o_ref):
    """Pass 2 (tiled): o = x * gate for one (C, tile_hw) spatial tile."""
    x = x_ref[0].astype(jnp.float32)
    o_ref[0] = (x * gate_ref[0]).astype(o_ref.dtype)


# -----------------------------------------------------------------------------
# Wrappers
# -----------------------------------------------------------------------------
def _gct_fused(x3, a, g, b, *, eps):
    n, c, hw = x3.shape
    itemsize = x3.dtype.itemsize
    cost = pl.CostEstimate(
        flops=5 * n * c * hw,
        transcendentals=3 * n * c,
        bytes_accessed=2 * n * c * hw * itemsize + 3 * c * 4,
    )
    return pl.pallas_call(
        functools.partial(_gct_fused_kernel, eps=eps, inv_c=1.0 / c),
        out_shape=jax.ShapeDtypeStruct((n, c, hw), x3.dtype),
        grid=(n,),
        in_specs=[
            pl.BlockSpec((1, c, hw), lambda i: (i, 0, 0)),
            pl.BlockSpec((c, 1), lambda i: (0, 0)),
            pl.BlockSpec((c, 1), lambda i: (0, 0)),
            pl.BlockSpec((c, 1), lambda i: (0, 0)),
        ],
        out_specs=pl.BlockSpec((1, c, hw), lambda i: (i, 0, 0)),
        compiler_params=pltpu.CompilerParams(
            dimension_semantics=("parallel",),
            vmem_limit_bytes=_vmem_limit_bytes(),
        ),
        cost_estimate=cost,
    )(x3, a, g, b)


def _gct_tiled(x3, a, g, b, *, eps, tile_hw=None):
    n, c, hw = x3.shape
    itemsize = x3.dtype.itemsize
    if tile_hw is None:
        tile_hw = _block_elem_budget(itemsize) // c   # scale block to VMEM budget
    tile_hw = max(128, _round_down(min(tile_hw, _round_up(hw, 128)), 128))
    n_tiles = pl.cdiv(hw, tile_hw)
    mask_tail = (hw % tile_hw) != 0
    vmem_limit = _vmem_limit_bytes()

    # Pass 1: per-batch, per-channel gate (tiny (N, C, 1) intermediate).
    reduce_cost = pl.CostEstimate(
        flops=2 * n * c * hw,
        transcendentals=3 * n * c,
        bytes_accessed=n * c * hw * itemsize + n * c * 4 + 3 * c * 4,
    )
    gate = pl.pallas_call(
        functools.partial(_gct_reduce_kernel, eps=eps, inv_c=1.0 / c,
                          hw=hw, tile_hw=tile_hw, mask_tail=mask_tail),
        out_shape=jax.ShapeDtypeStruct((n, c, 1), jnp.float32),
        grid=(n, n_tiles),
        in_specs=[
            pl.BlockSpec((1, c, tile_hw), lambda i, j: (i, 0, j)),
            pl.BlockSpec((c, 1), lambda i, j: (0, 0)),
            pl.BlockSpec((c, 1), lambda i, j: (0, 0)),
            pl.BlockSpec((c, 1), lambda i, j: (0, 0)),
        ],
        out_specs=pl.BlockSpec((1, c, 1), lambda i, j: (i, 0, 0)),
        scratch_shapes=[pltpu.VMEM((c, 1), jnp.float32)],
        compiler_params=pltpu.CompilerParams(
            dimension_semantics=("parallel", "arbitrary"),
            vmem_limit_bytes=vmem_limit,
        ),
        cost_estimate=reduce_cost,
    )(x3, a, g, b)

    # Pass 2: apply gate, lane-dense spatial tiles.
    apply_cost = pl.CostEstimate(
        flops=n * c * hw,
        transcendentals=0,
        bytes_accessed=2 * n * c * hw * itemsize + n * c * 4,
    )
    out = pl.pallas_call(
        _gct_apply_kernel,
        out_shape=jax.ShapeDtypeStruct((n, c, hw), x3.dtype),
        grid=(n, n_tiles),
        in_specs=[
            pl.BlockSpec((1, c, tile_hw), lambda i, j: (i, 0, j)),
            pl.BlockSpec((1, c, 1), lambda i, j: (i, 0, 0)),
        ],
        out_specs=pl.BlockSpec((1, c, tile_hw), lambda i, j: (i, 0, j)),
        compiler_params=pltpu.CompilerParams(
            dimension_semantics=("parallel", "parallel"),
            vmem_limit_bytes=vmem_limit,
        ),
        cost_estimate=apply_cost,
    )(x3, gate)
    return out


def gct_forward(x, alpha, gamma, beta, *, eps=EPS, tile_hw=None, force_tiled=False):
    """GCT forward (mode='l2').  x: (N, C, H, W); alpha/gamma/beta: (1, C, 1, 1).

    Output dtype == input dtype (math is done in f32 in-register).
    """
    n, c, h, w = x.shape
    hw = h * w

    def prep(p):
        return p.reshape(c, 1).astype(jnp.float32)

    a_p, g_p, b_p = prep(alpha), prep(gamma), prep(beta)
    x3 = x.reshape(n, c, hw)            # free reshape, keeps input dtype

    elem_budget = _block_elem_budget(x.dtype.itemsize)
    # TODO(synk): for N == 1 on v7x, split the spatial axis across the two
    # TensorCores (per-core partial sum-of-squares) so both cores are fed.
    if (not force_tiled) and c * hw <= elem_budget:
        out3 = _gct_fused(x3, a_p, g_p, b_p, eps=eps)
    else:
        out3 = _gct_tiled(x3, a_p, g_p, b_p, eps=eps, tile_hw=tile_hw)
    return out3.reshape(n, c, h, w)


# -----------------------------------------------------------------------------
# Pure-JAX reference (mirrors the PyTorch module, mode='l2')
# -----------------------------------------------------------------------------
def gct_ref(x, alpha, gamma, beta, eps=EPS):
    emb = jnp.sqrt(jnp.sum(x * x, axis=(2, 3), keepdims=True) + eps) * alpha
    norm = gamma / jnp.sqrt(jnp.mean(emb * emb, axis=1, keepdims=True) + eps)
    gate = 1.0 + jnp.tanh(emb * norm + beta)
    return x * gate


# -----------------------------------------------------------------------------
# Main
# -----------------------------------------------------------------------------
if __name__ == "__main__":
    key = jax.random.PRNGKey(0)
    k1, k2, k3, k4 = jax.random.split(key, 4)

    C = 12
    # Torch default init (alpha=1, gamma=0, beta=0) is an identity gate; use
    # non-trivial deterministic values so the gating math is exercised.
    alpha = 1.0 + 0.1 * jax.random.normal(k2, (1, C, 1, 1), jnp.float32)
    gamma = 0.2 * jax.random.normal(k3, (1, C, 1, 1), jnp.float32)
    beta = 0.1 * jax.random.normal(k4, (1, C, 1, 1), jnp.float32)

    fwd_auto = jax.jit(gct_forward)
    fwd_tiled = jax.jit(functools.partial(gct_forward, force_tiled=True, tile_hw=128))

    # --- f32, unaligned spatial extent (H*W = 130): full-extent fused blocks
    # --- and a masked ragged last tile in the tiled path.
    N, H, W = 2, 10, 13
    x = jax.random.normal(k1, (N, C, H, W), jnp.float32)
    ref = gct_ref(x, alpha, gamma, beta)

    out_fused = jax.block_until_ready(fwd_auto(x, alpha, gamma, beta))
    out_tiled = jax.block_until_ready(fwd_tiled(x, alpha, gamma, beta))
    for name, out in (("fused_f32", out_fused), ("tiled_f32", out_tiled)):
        assert out.shape == ref.shape and out.dtype == ref.dtype, name
        assert bool(jnp.all(jnp.isfinite(out))), f"non-finite output ({name})"
        err = float(jnp.max(jnp.abs(out - ref)))
        assert err < 1e-4, f"{name} mismatch vs reference: max abs err = {err}"

    # --- bf16 input: dtype preserved end-to-end (halves HBM traffic), math in f32.
    Hb, Wb = 16, 16
    xb = jax.random.normal(k1, (N, C, Hb, Wb), jnp.float32).astype(jnp.bfloat16)
    refb = gct_ref(xb.astype(jnp.float32), alpha, gamma, beta)

    outb_fused = jax.block_until_ready(fwd_auto(xb, alpha, gamma, beta))
    outb_tiled = jax.block_until_ready(fwd_tiled(xb, alpha, gamma, beta))
    for name, out in (("fused_bf16", outb_fused), ("tiled_bf16", outb_tiled)):
        assert out.shape == refb.shape and out.dtype == jnp.bfloat16, name
        assert bool(jnp.all(jnp.isfinite(out.astype(jnp.float32)))), name
        err = float(jnp.max(jnp.abs(out.astype(jnp.float32) - refb)))
        assert err < 5e-2, f"{name} mismatch vs reference: max abs err = {err}"

    print("KERNEL_OK")
</pallas_src>

<mosaic_0001>
module attributes {stable_mosaic.version = 11 : i64} {
  func.func @_gct_fused_kernel(%arg0: i32, %arg1: memref<1x12x130xf32, #tpu.memory_space<vmem>>, %arg2: memref<12x1xf32, #tpu.memory_space<vmem>>, %arg3: memref<12x1xf32, #tpu.memory_space<vmem>>, %arg4: memref<12x1xf32, #tpu.memory_space<vmem>>, %arg5: memref<1x12x130xf32, #tpu.memory_space<vmem>>) attributes {dimension_semantics = [#tpu.dimension_semantics<parallel>], iteration_bounds = array<i64: 2>, scalar_prefetch = 0 : i64, scratch_operands = 0 : i64, tpu.core_type = #tpu.core_type<tc>, window_params = [{transform_indices = @transform_0, window_bounds = array<i64: 1, 12, 130>}, {pipeline_mode = #tpu.pipeline_mode<synchronous>, transform_indices = @transform_1, window_bounds = array<i64: 12, 1>}, {pipeline_mode = #tpu.pipeline_mode<synchronous>, transform_indices = @transform_2, window_bounds = array<i64: 12, 1>}, {pipeline_mode = #tpu.pipeline_mode<synchronous>, transform_indices = @transform_3, window_bounds = array<i64: 12, 1>}, {transform_indices = @transform_4, window_bounds = array<i64: 1, 12, 130>}]} {
    %c0 = arith.constant 0 : index
    %c0_0 = arith.constant 0 : index
    %c0_1 = arith.constant 0 : index
    %0 = vector.load %arg1[%c0, %c0_0, %c0_1] : memref<1x12x130xf32, #tpu.memory_space<vmem>>, vector<1x12x130xf32>
    %1 = vector.shape_cast %0 : vector<1x12x130xf32> to vector<12x130xf32>
    %2 = arith.mulf %1, %1 : vector<12x130xf32>
    %cst = arith.constant dense<0.000000e+00> : vector<12xf32>
    %3 = vector.multi_reduction <add>, %2, %cst [1] : vector<12x130xf32> to vector<12xf32>
    %4 = vector.shape_cast %3 : vector<12xf32> to vector<12x1xf32>
    %cst_2 = arith.constant 9.99999974E-6 : f32
    %5 = vector.broadcast %cst_2 : f32 to vector<12x1xf32>
    %6 = arith.addf %4, %5 : vector<12x1xf32>
    %7 = math.sqrt %6 : vector<12x1xf32>
    %c0_3 = arith.constant 0 : index
    %c0_4 = arith.constant 0 : index
    %8 = vector.load %arg2[%c0_3, %c0_4] : memref<12x1xf32, #tpu.memory_space<vmem>>, vector<12x1xf32>
    %9 = arith.mulf %7, %8 : vector<12x1xf32>
    %10 = arith.mulf %9, %9 : vector<12x1xf32>
    %cst_5 = arith.constant dense<0.000000e+00> : vector<1xf32>
    %11 = vector.multi_reduction <add>, %10, %cst_5 [0] : vector<12x1xf32> to vector<1xf32>
    %12 = vector.shape_cast %11 : vector<1xf32> to vector<1x1xf32>
    %cst_6 = arith.constant 0.0833333358 : f32
    %13 = vector.broadcast %cst_6 : f32 to vector<1x1xf32>
    %14 = arith.mulf %12, %13 : vector<1x1xf32>
    %c0_7 = arith.constant 0 : index
    %c0_8 = arith.constant 0 : index
    %15 = vector.load %arg3[%c0_7, %c0_8] : memref<12x1xf32, #tpu.memory_space<vmem>>, vector<12x1xf32>
    %cst_9 = arith.constant 9.99999974E-6 : f32
    %16 = vector.broadcast %cst_9 : f32 to vector<1x1xf32>
    %17 = arith.addf %14, %16 : vector<1x1xf32>
    %18 = math.rsqrt %17 : vector<1x1xf32>
    %19 = vector.broadcast %18 : vector<1x1xf32> to vector<12x1xf32>
    %20 = arith.mulf %15, %19 : vector<12x1xf32>
    %21 = arith.mulf %9, %20 : vector<12x1xf32>
    %c0_10 = arith.constant 0 : index
    %c0_11 = arith.constant 0 : index
    %22 = vector.load %arg4[%c0_10, %c0_11] : memref<12x1xf32, #tpu.memory_space<vmem>>, vector<12x1xf32>
    %23 = arith.addf %21, %22 : vector<12x1xf32>
    %24 = math.tanh %23 : vector<12x1xf32>
    %cst_12 = arith.constant 1.000000e+00 : f32
    %25 = vector.broadcast %cst_12 : f32 to vector<12x1xf32>
    %26 = arith.addf %25, %24 : vector<12x1xf32>
    %27 = vector.broadcast %26 : vector<12x1xf32> to vector<12x130xf32>
    %28 = arith.mulf %1, %27 : vector<12x130xf32>
    %c0_13 = arith.constant 0 : index
    %c0_14 = arith.constant 0 : index
    %c0_15 = arith.constant 0 : index
    %29 = vector.load %arg5[%c0_13, %c0_14, %c0_15] : memref<1x12x130xf32, #tpu.memory_space<vmem>>, vector<1x12x130xf32>
    %30 = vector.shape_cast %29 : vector<1x12x130xf32> to vector<12x130xf32>
    %31 = vector.shape_cast %28 : vector<12x130xf32> to vector<1x12x130xf32>
    tpu.vector_store %arg5[%c0_13, %c0_14, %c0_15], %31 {strides = array<i32>} : memref<1x12x130xf32, #tpu.memory_space<vmem>>, vector<1x12x130xf32>,
    return
  }
  func.func @transform_0(%arg0: i32) -> (i32, i32, i32) {
    %c0_i32 = arith.constant 0 : i32
    %c0_i32_0 = arith.constant 0 : i32
    %c0_i32_1 = arith.constant 0 : i32
    return %arg0, %c0_i32, %c0_i32_0 : i32, i32, i32
  }
  func.func @transform_1(%arg0: i32) -> (i32, i32) {
    %c0_i32 = arith.constant 0 : i32
    %c0_i32_0 = arith.constant 0 : i32
    %c0_i32_1 = arith.constant 0 : i32
    return %c0_i32, %c0_i32_0 : i32, i32
  }
  func.func @transform_2(%arg0: i32) -> (i32, i32) {
    %c0_i32 = arith.constant 0 : i32
    %c0_i32_0 = arith.constant 0 : i32
    %c0_i32_1 = arith.constant 0 : i32
    return %c0_i32, %c0_i32_0 : i32, i32
  }
  func.func @transform_3(%arg0: i32) -> (i32, i32) {
    %c0_i32 = arith.constant 0 : i32
    %c0_i32_0 = arith.constant 0 : i32
    %c0_i32_1 = arith.constant 0 : i32
    return %c0_i32, %c0_i32_0 : i32, i32
  }
  func.func @transform_4(%arg0: i32) -> (i32, i32, i32) {
    %c0_i32 = arith.constant 0 : i32
    %c0_i32_0 = arith.constant 0 : i32
    %c0_i32_1 = arith.constant 0 : i32
    return %arg0, %c0_i32, %c0_i32_0 : i32, i32, i32
  }
}

</mosaic_0001>

<bundles_post_ra>
// kernel: gct_forward.1
= control target key start
LH: loop header
LB: loop body
LE: loop exit
PB: predicated region body
PF: predicated region fallthrough
CT: control target
= control target key end

     0   :  { %s409_s15 = smov 0   ;;  %s475_s0 = inlined_call_operand.vmem [shape: f32[2,12,130], index: 0, kind: input, shape index: {}]   ;;  %s476_s1 = inlined_call_operand.vmem [shape: f32[12,1], index: 1, kind: input, shape index: {}]   ;;  %s477_s2 = inlined_call_operand.vmem [shape: f32[12,1], index: 2, kind: input, shape index: {}]   ;;  %s478_s3 = inlined_call_operand.vmem [shape: f32[12,1], index: 3, kind: input, shape index: {}]   ;;  %s479_s4 = inlined_call_operand.vmem [shape: f32[2,12,130], index: 4, kind: output, shape index: {}]  }
   0x1 LB: > { %s341_s16 = sadd.s32 4294967295, %s381_s15   ;;  %p345_p0 = scmp.ge.s32.totalorder %s381_s15, 1  ;;  %s381_s15 = sphi %s409_s15, %s14_s15  }
   0x2   : > { %p162_p1 = scmp.lt.s32.totalorder %s381_s15, 3 }
   0x4   : > { %p163_p2 = pnand %p345_p0, %p162_p1 }
   0x5   : > { %p188_p3 = scmp.lt.s32.totalorder (!%p163_p2), %s341_s16, 1 }
   0x6   : > { %166 = sbr.rel (%p163_p2) target bundleno = 372 (0x174), region = 36 }
   0xb   : > { %s481_s16 = smov (!%p188_p3, %s341_s16), 1  ;;  %vm206_vm0 = vcmask 15360   ;;  %vm211_vm1 = vcmask 1043456   ;;  %vm213_vm2 = vcmask 11264   ;;  %v383_v13 = vmov 0   ;;  %v234_v21 = vld [vmem:[%s476_s1] sm:$0xff] }
   0xc   : > { %s352_s17 = sshll.u32 %s481_s16, 5  ;;  %363 = vset.pattern.permute.xlu1 %v383_v13  ;;  %364 = vset.pattern.permute.xlu0 %v383_v13  ;;  %v235_v28 = vld [vmem:[%s476_s1 + $0x8] sm:$0xf]  ;;  %vm240_vm7 = vcmask 7168   ;;  %vm242_vm8 = vcmask 3072   ;;  %v252_v45 = vld [vmem:[%s477_s2] sm:$0xff] }
   0xd   : > { %s192_s20 = scalar_lea.vmem %s475_s0, %s352_s17  ;;  %v253_v46 = vld [vmem:[%s477_s2 + $0x8] sm:$0xf]  ;;  %v260_v50 = vld [vmem:[%s478_s3] sm:$0xff]  ;;  %s197_s9 = scalar_lea.vmem %s479_s4, %s352_s17 }
   0xe   : > { %v425_v0 = vld [vmem:[%s192_s20] sm:$0xff]  ;;  %v427_v1 = vld [vmem:[%s192_s20 + $0x8] sm:$0xff]  ;;  %v429_v2 = vld [vmem:[%s192_s20 + $0x10] sm:$0xf] }
   0xf   : > { %v202_v3 = vmul.f32 %v425_v0, %v425_v0  ;;  %v203_v4 = vmul.f32 %v427_v1, %v427_v1  ;;  %v435_v5 = vld [vmem:[%s192_s20 + $0x18] sm:$0xf]  ;;  %v204_v6 = vmul.f32 %v429_v2, %v429_v2  ;;  %v261_v51 = vld [vmem:[%s478_s3 + $0x8] sm:$0xf] }
  0x10   : > { %v205_v7 = vmul.f32 %v435_v5, %v435_v5 }
  0x11   : > { %v207_v8 = vsel %vm206_vm0, %v203_v4, 0.0  ;;  %v212_v9 = vsel %vm211_vm1, %v204_v6, 0.0 }
  0x12   : > { %v208_v10 = vadd.f32 %v207_v8, %v202_v3  ;;  %v214_v11 = vsel %vm213_vm2, %v205_v7, 0.0 }
  0x13   : > { %v215_v12 = vadd.f32 %v214_v11, %v212_v9 }
  0x14   : > { %209 = vadd.xlane.f32.xlu0 %v208_v10 }
  0x18   : > { %216 = vadd.xlane.f32.xlu0 %v215_v12 }
  0x9d   : > { %v210_v14 = vpop.xlane.xlu0 %209 }
  0x9e   : > { %v218_v15 = vadd.f32 1e-05, %v210_v14 }
  0xa0   : > { %365 = vrsqrt.f32 %v218_v15  ;;  %vm222_vm3 = vcmp.eq.f32.partialorder %v218_v15, inf  ;;  %v225_v20 = vand.u32 2147483648, %v218_v15  ;;  %vm224_vm4 = vcmp.eq.f32.partialorder %v218_v15, 0.0 }
  0xa1   : > { %v217_v16 = vpop.xlane.xlu0 %216 }
  0xa2   : > { %v219_v17 = vadd.f32 1e-05, %v217_v16 }
  0xa4   : > { %367 = vrsqrt.f32 %v219_v17  ;;  %vm229_vm5 = vcmp.eq.f32.partialorder %v219_v17, inf  ;;  %v232_v27 = vand.u32 2147483648, %v219_v17  ;;  %vm231_vm6 = vcmp.eq.f32.partialorder %v219_v17, 0.0 }
  0xad   : > { %v366_v18 = vpop.eup %365 }
  0xae   : > { %v221_v19 = vmul.f32 %v366_v18, %v218_v15 }
  0xb0   : > { %v223_v22 = vsel %vm222_vm3, %v218_v15, %v221_v19 }
  0xb1   : > { %v368_v23 = vpop.eup %367  ;;  %v226_v24 = vsel %vm224_vm4, %v225_v20, %v223_v22 }
  0xb2   : > { %v228_v25 = vmul.f32 %v368_v23, %v219_v17  ;;  %v236_v26 = vmul.f32 %v234_v21, %v226_v24 }
  0xb4   : > { %v230_v29 = vsel %vm229_vm5, %v219_v17, %v228_v25  ;;  %v238_v32 = vmul.f32 %v236_v26, %v236_v26 }
  0xb5   : > { %v233_v30 = vsel %vm231_vm6, %v232_v27, %v230_v29 }
  0xb6   : > { %v237_v31 = vmul.f32 %v235_v28, %v233_v30  ;;  %v241_v34 = vsel %vm240_vm7, %v238_v32, 0.0 }
  0xb8   : > { %v239_v33 = vmul.f32 %v237_v31, %v237_v31 }
  0xba   : > { %v243_v35 = vsel %vm242_vm8, %v239_v33, 0.0 }
  0xbb   : > { %v244_v36 = vadd.f32 %v243_v35, %v241_v34 }
  0xbd   : > { %v245_v37 = vrot.slane %v244_v36, 4 }
  0xbf   : > { %v246_v38 = vadd.f32 %v245_v37, %v244_v36 }
  0xc1   : > { %v247_v39 = vrot.slane %v246_v38, 2 }
  0xc3   : > { %v248_v40 = vadd.f32 %v247_v39, %v246_v38 }
  0xc5   : > { %v249_v41 = vrot.slane %v248_v40, 1 }
  0xc7   : > { %v250_v42 = vadd.f32 %v249_v41, %v248_v40 }
  0xc9   : > { %v251_v43 = vmul.f32 0.083333336, %v250_v42 }
  0xcb   : > { %v254_v44 = vadd.f32 1e-05, %v251_v43 }
  0xcd   : > { %369 = vrsqrt.f32 %v254_v44 }
  0xda   : > { %v370_v47 = vpop.eup %369 }
  0xdb   : > { %v256_v48 = vmul.f32 %v370_v47, %v252_v45  ;;  %v257_v49 = vmul.f32 %v370_v47, %v253_v46 }
  0xdd   : > { %v258_v52 = vmul.f32 %v256_v48, %v236_v26  ;;  %v259_v53 = vmul.f32 %v257_v49, %v237_v31 }
  0xdf   : > { %v262_v54 = vadd.f32 %v260_v50, %v258_v52  ;;  %v263_v55 = vadd.f32 %v261_v51, %v259_v53 }
  0xe1   : > { %371 = vtanh.f32 %v262_v54 }
  0xe2   : > { %373 = vtanh.f32 %v263_v55 }
  0xee   : > { %v372_v56 = vpop.eup %371 }
  0xef   : > { %v266_v57 = vadd.f32 1.0, %v372_v56  ;;  %v374_v58 = vpop.eup %373 }
  0xf0   : > { %v267_v59 = vadd.f32 1.0, %v374_v58 }
  0xf1   : > { %270 = vperm.xlu1 %363, %v266_v57  }
  0xf5   : > { %275 = vperm.xlu1 %363, %v267_v59  }
 0x16c   : > { %v271_v60 = vpop.permute.xlu1 %270 }
 0x16d   : > { %v278_v61 = vmul.f32 %v271_v60, %v425_v0  ;;  %v279_v62 = vmul.f32 %v271_v60, %v427_v1 }
 0x16f   : > { %282 = vst [vmem:[%s197_s9] sm:$0xff] %v278_v61  ;;  %283 = vst.msk [vmem:[%s197_s9 + $0x8] sm:$0xff] %vm206_vm0, %v279_v62 }
 0x170   : > { %v276_v63 = vpop.permute.xlu1 %275 }
 0x171   : > { %v280_v3 = vmul.f32 %v276_v63, %v429_v2  ;;  %v281_v4 = vmul.f32 %v276_v63, %v435_v5 }
 0x173   : > { %284 = vst [vmem:[%s197_s9 + $0x10] sm:$0xf] %v280_v3  ;;  %285 = vst.msk [vmem:[%s197_s9 + $0x18] sm:$0xf] %vm213_vm2, %v281_v4 }
 0x174 PF: > { %s14_s15 = sadd.s32 1, %s381_s15  }
 0x175   : > { %p11_p4 = scmp.ge.s32.totalorder %s14_s15, 4  }
 0x177   :  { %13 = sbr.rel (!%p11_p4) target bundleno = 1 (0x1), region = 66 }

</bundles_post_ra>
